<compile_context>
chip_gen: v7x
topology: tpu7x:2x2x1
jax: 0.10.0
libtpu: 0.0.40
codegen_flags: <defaults>
</compile_context>

<pallas_src>
from functools import partial

import jax
import jax.numpy as jnp
from jax.experimental import pallas as pl
from jax.experimental.pallas import tpu as pltpu


def _tsoftmax_kernel(t_ref, x_ref, o_ref, *, seg_len, n_seg):
    """x_ref/o_ref: (bm, n_seg * seg_len) VMEM tiles; each row holds n_seg
    independent softmax segments of width seg_len (n_seg == 1 is the plain case)."""
    t = t_ref[0]
    x = x_ref[...].astype(jnp.float32)            # (bm, n_seg * seg_len), lane-dense
    bm = x.shape[0]

    def seg_reduce(v, reduce_fn):
        # List of (bm, 1) per-segment reductions over the last axis.
        if n_seg == 1:
            return [reduce_fn(v, axis=-1, keepdims=True)]
        return [reduce_fn(v[:, k * seg_len:(k + 1) * seg_len],
                          axis=-1, keepdims=True)
                for k in range(n_seg)]            # static, small (<= 16)

    def seg_broadcast(parts):
        # Broadcast per-segment stats back lane-dense so elementwise math stays dense.
        if n_seg == 1:
            return parts[0]                        # (bm, 1) broadcasts against (bm, Df)
        return jnp.concatenate(
            [jnp.broadcast_to(p, (bm, seg_len)) for p in parts], axis=-1)

    maxes = seg_broadcast(seg_reduce(x, jnp.max))
    xm = x - maxes                                 # <= 0
    w = jnp.maximum(xm + t, 0.0) + 1e-8            # in (1e-8, t + 1e-8]

    # softmax(xm + log w) == (w * exp(xm)) / sum(w * exp(xm)); no second max needed.
    e = w * jnp.exp(xm)
    den_parts = seg_reduce(e, jnp.sum)             # each (bm, 1), >= 1e-8
    inv = seg_broadcast([pl.reciprocal(p, approx=False) for p in den_parts])
    o_ref[...] = (e * inv).astype(o_ref.dtype)


def t_softmax_pallas(x, t=None, block_rows=None):
    """t-softmax along the last axis. x: any shape, t: non-negative scalar."""
    if t is None:
        t = 0.5
    orig_shape = x.shape
    D = orig_shape[-1]
    x2d = x.reshape(-1, D)
    R = x2d.shape[0]

    # ---- lane-dense folding for narrow feature dims (free, contiguous reshape) ----
    g = 1
    if D < 128 and 128 % D == 0:
        cand = 128 // D
        if cand > 1 and R % cand == 0:
            g = cand
    Rf, Df = R // g, D * g
    xf = x2d.reshape(Rf, Df)

    in_bytes = jnp.dtype(x.dtype).itemsize

    # ---- pick the row tile from the VMEM budget (per-generation) ----
    try:
        vmem_cap = int(pltpu.get_tpu_info().vmem_capacity_bytes)
    except Exception:
        vmem_cap = 64 * 1024 * 1024                # conservative (v7x physical VMEM)
    budget = min(vmem_cap // 2, 48 * 1024 * 1024)  # headroom for scratch / regalloc

    if block_rows is None:
        per_row_bytes = 4 * in_bytes * Df          # 2x double-buffered (in + out) tiles
        bm_budget = max(int(budget // per_row_bytes), 8)
        bm_tile = max(int((8 << 20) // (in_bytes * Df)), 8)   # ~8 MiB input tile target
        bm_raw = max(min(bm_budget, bm_tile, 8192), 8)
        bm = 1 << (bm_raw.bit_length() - 1)        # round down to a power of two (>= 8)
        # keep >= ~8 grid steps when rows allow it (feeds both TCs / pipeline depth)
        while bm > 128 and Rf < 8 * bm:
            bm //= 2
    else:
        bm = max(8, (int(block_rows) // 8) * 8)
    if Rf <= bm:
        bm = Rf                                    # single full-extent block is allowed
    grid_rows = pl.cdiv(Rf, bm)                    # ragged last block; no jnp.pad

    footprint = 4 * bm * Df * in_bytes             # double-buffered in + out tiles
    vmem_limit = max(32 * 1024 * 1024,
                     min(vmem_cap - (8 << 20), footprint + (16 << 20)))

    # t must be >= 0 (as asserted in the PyTorch reference); not re-checked here.
    t_arr = jnp.asarray(t, dtype=jnp.float32).reshape((1,))

    kernel = partial(_tsoftmax_kernel, seg_len=D, n_seg=g)
    out = pl.pallas_call(
        kernel,
        out_shape=jax.ShapeDtypeStruct((Rf, Df), x.dtype),
        grid=(grid_rows,),
        in_specs=[
            pl.BlockSpec(memory_space=pltpu.SMEM),           # t (scalar)
            pl.BlockSpec((bm, Df), lambda i: (i, 0)),        # x tile (lane-dense)
        ],
        out_specs=pl.BlockSpec((bm, Df), lambda i: (i, 0)),
        compiler_params=pltpu.CompilerParams(
            dimension_semantics=("parallel",),
            vmem_limit_bytes=int(vmem_limit)),
    )(t_arr, xf)

    return out.reshape(orig_shape)


def _t_softmax_ref(x, t):
    # pure-JAX reference, mirrors the PyTorch code
    maxes = jnp.max(x, axis=-1, keepdims=True)
    xm = x - maxes
    w = jax.nn.relu(xm + t) + 1e-8
    return jax.nn.softmax(xm + jnp.log(w), axis=-1)


if __name__ == "__main__":
    key0, key1 = jax.random.split(jax.random.PRNGKey(0))
    t = jnp.float32(0.5)

    # Case 1: (batch, seq, hidden) with narrow hidden (D=32) -> lane-folded path.
    x1 = jax.random.normal(key0, (2, 8, 32), dtype=jnp.float32)
    o1 = jax.block_until_ready(t_softmax_pallas(x1, t))
    r1 = _t_softmax_ref(x1, t)
    assert o1.shape == x1.shape and o1.dtype == x1.dtype
    assert jnp.allclose(o1, r1, atol=1e-5, rtol=1e-5)
    assert jnp.allclose(jnp.sum(o1, axis=-1), 1.0, atol=1e-5)

    # Case 2: wider feature dim, row count not a multiple of the block ->
    # ragged last grid step (no padding pass), un-folded path.
    x2 = 3.0 * jax.random.normal(key1, (5, 40, 160), dtype=jnp.float32)
    o2 = jax.block_until_ready(t_softmax_pallas(x2, t))
    r2 = _t_softmax_ref(x2, t)
    assert o2.shape == x2.shape and o2.dtype == x2.dtype
    assert jnp.allclose(o2, r2, atol=1e-5, rtol=1e-5)
    assert jnp.allclose(jnp.sum(o2, axis=-1), 1.0, atol=1e-5)

    print("KERNEL_OK")
</pallas_src>

<mosaic_0001>
module attributes {stable_mosaic.version = 11 : i64} {
  func.func @_tsoftmax_kernel(%arg0: i32, %arg1: memref<1xf32, #tpu.memory_space<smem>>, %arg2: memref<4x128xf32, #tpu.memory_space<vmem>>, %arg3: memref<4x128xf32, #tpu.memory_space<vmem>>) attributes {dimension_semantics = [#tpu.dimension_semantics<parallel>], iteration_bounds = array<i64: 1>, scalar_prefetch = 0 : i64, scratch_operands = 0 : i64, tpu.core_type = #tpu.core_type<tc>, window_params = [{transform_indices = @transform_0, window_bounds = array<i64: 1>}, {transform_indices = @transform_1, window_bounds = array<i64: 4, 128>}, {transform_indices = @transform_2, window_bounds = array<i64: 4, 128>}]} {
    %c0 = arith.constant 0 : index
    %0 = memref.load %arg1[%c0] : memref<1xf32, #tpu.memory_space<smem>>
    %c0_0 = arith.constant 0 : index
    %c0_1 = arith.constant 0 : index
    %1 = vector.load %arg2[%c0_0, %c0_1] : memref<4x128xf32, #tpu.memory_space<vmem>>, vector<4x128xf32>
    %2 = vector.extract_strided_slice %1 {offsets = [0, 0], sizes = [4, 32], strides = [1, 1]} : vector<4x128xf32> to vector<4x32xf32>
    %cst = arith.constant dense<0xFF800000> : vector<4xf32>
    %3 = vector.multi_reduction <maximumf>, %2, %cst [1] : vector<4x32xf32> to vector<4xf32>
    %4 = vector.shape_cast %3 : vector<4xf32> to vector<4x1xf32>
    %5 = vector.extract_strided_slice %1 {offsets = [0, 32], sizes = [4, 32], strides = [1, 1]} : vector<4x128xf32> to vector<4x32xf32>
    %cst_2 = arith.constant dense<0xFF800000> : vector<4xf32>
    %6 = vector.multi_reduction <maximumf>, %5, %cst_2 [1] : vector<4x32xf32> to vector<4xf32>
    %7 = vector.shape_cast %6 : vector<4xf32> to vector<4x1xf32>
    %8 = vector.extract_strided_slice %1 {offsets = [0, 64], sizes = [4, 32], strides = [1, 1]} : vector<4x128xf32> to vector<4x32xf32>
    %cst_3 = arith.constant dense<0xFF800000> : vector<4xf32>
    %9 = vector.multi_reduction <maximumf>, %8, %cst_3 [1] : vector<4x32xf32> to vector<4xf32>
    %10 = vector.shape_cast %9 : vector<4xf32> to vector<4x1xf32>
    %11 = vector.extract_strided_slice %1 {offsets = [0, 96], sizes = [4, 32], strides = [1, 1]} : vector<4x128xf32> to vector<4x32xf32>
    %cst_4 = arith.constant dense<0xFF800000> : vector<4xf32>
    %12 = vector.multi_reduction <maximumf>, %11, %cst_4 [1] : vector<4x32xf32> to vector<4xf32>
    %13 = vector.shape_cast %12 : vector<4xf32> to vector<4x1xf32>
    %14 = vector.shape_cast %4 : vector<4x1xf32> to vector<4x1xf32>
    %15 = vector.broadcast %14 : vector<4x1xf32> to vector<4x32xf32>
    %16 = vector.shape_cast %7 : vector<4x1xf32> to vector<4x1xf32>
    %17 = vector.broadcast %16 : vector<4x1xf32> to vector<4x32xf32>
    %18 = vector.shape_cast %10 : vector<4x1xf32> to vector<4x1xf32>
    %19 = vector.broadcast %18 : vector<4x1xf32> to vector<4x32xf32>
    %20 = vector.shape_cast %13 : vector<4x1xf32> to vector<4x1xf32>
    %21 = vector.broadcast %20 : vector<4x1xf32> to vector<4x32xf32>
    %22 = tpu.concatenate %15, %17, %19, %21 in 1 : vector<4x32xf32>, vector<4x32xf32>, vector<4x32xf32>, vector<4x32xf32> -> vector<4x128xf32>
    %23 = arith.subf %1, %22 : vector<4x128xf32>
    %24 = vector.broadcast %0 : f32 to vector<4x128xf32>
    %25 = arith.addf %23, %24 : vector<4x128xf32>
    %cst_5 = arith.constant 0.000000e+00 : f32
    %26 = vector.broadcast %cst_5 : f32 to vector<4x128xf32>
    %27 = arith.maximumf %25, %26 : vector<4x128xf32>
    %cst_6 = arith.constant 9.99999993E-9 : f32
    %28 = vector.broadcast %cst_6 : f32 to vector<4x128xf32>
    %29 = arith.addf %27, %28 : vector<4x128xf32>
    %30 = math.exp %23 : vector<4x128xf32>
    %31 = arith.mulf %29, %30 : vector<4x128xf32>
    %32 = vector.extract_strided_slice %31 {offsets = [0, 0], sizes = [4, 32], strides = [1, 1]} : vector<4x128xf32> to vector<4x32xf32>
    %cst_7 = arith.constant dense<0.000000e+00> : vector<4xf32>
    %33 = vector.multi_reduction <add>, %32, %cst_7 [1] : vector<4x32xf32> to vector<4xf32>
    %34 = vector.shape_cast %33 : vector<4xf32> to vector<4x1xf32>
    %35 = vector.extract_strided_slice %31 {offsets = [0, 32], sizes = [4, 32], strides = [1, 1]} : vector<4x128xf32> to vector<4x32xf32>
    %cst_8 = arith.constant dense<0.000000e+00> : vector<4xf32>
    %36 = vector.multi_reduction <add>, %35, %cst_8 [1] : vector<4x32xf32> to vector<4xf32>
    %37 = vector.shape_cast %36 : vector<4xf32> to vector<4x1xf32>
    %38 = vector.extract_strided_slice %31 {offsets = [0, 64], sizes = [4, 32], strides = [1, 1]} : vector<4x128xf32> to vector<4x32xf32>
    %cst_9 = arith.constant dense<0.000000e+00> : vector<4xf32>
    %39 = vector.multi_reduction <add>, %38, %cst_9 [1] : vector<4x32xf32> to vector<4xf32>
    %40 = vector.shape_cast %39 : vector<4xf32> to vector<4x1xf32>
    %41 = vector.extract_strided_slice %31 {offsets = [0, 96], sizes = [4, 32], strides = [1, 1]} : vector<4x128xf32> to vector<4x32xf32>
    %cst_10 = arith.constant dense<0.000000e+00> : vector<4xf32>
    %42 = vector.multi_reduction <add>, %41, %cst_10 [1] : vector<4x32xf32> to vector<4xf32>
    %43 = vector.shape_cast %42 : vector<4xf32> to vector<4x1xf32>
    %44 = tpu.reciprocal %34 : vector<4x1xf32> -> vector<4x1xf32>
    %45 = tpu.reciprocal %37 : vector<4x1xf32> -> vector<4x1xf32>
    %46 = tpu.reciprocal %40 : vector<4x1xf32> -> vector<4x1xf32>
    %47 = tpu.reciprocal %43 : vector<4x1xf32> -> vector<4x1xf32>
    %48 = vector.shape_cast %44 : vector<4x1xf32> to vector<4x1xf32>
    %49 = vector.broadcast %48 : vector<4x1xf32> to vector<4x32xf32>
    %50 = vector.shape_cast %45 : vector<4x1xf32> to vector<4x1xf32>
    %51 = vector.broadcast %50 : vector<4x1xf32> to vector<4x32xf32>
    %52 = vector.shape_cast %46 : vector<4x1xf32> to vector<4x1xf32>
    %53 = vector.broadcast %52 : vector<4x1xf32> to vector<4x32xf32>
    %54 = vector.shape_cast %47 : vector<4x1xf32> to vector<4x1xf32>
    %55 = vector.broadcast %54 : vector<4x1xf32> to vector<4x32xf32>
    %56 = tpu.concatenate %49, %51, %53, %55 in 1 : vector<4x32xf32>, vector<4x32xf32>, vector<4x32xf32>, vector<4x32xf32> -> vector<4x128xf32>
    %57 = arith.mulf %31, %56 : vector<4x128xf32>
    %c0_11 = arith.constant 0 : index
    %c0_12 = arith.constant 0 : index
    %58 = vector.load %arg3[%c0_11, %c0_12] : memref<4x128xf32, #tpu.memory_space<vmem>>, vector<4x128xf32>
    tpu.vector_store %arg3[%c0_11, %c0_12], %57 {strides = array<i32>} : memref<4x128xf32, #tpu.memory_space<vmem>>, vector<4x128xf32>,
    return
  }
  func.func @transform_0(%arg0: i32) -> i32 {
    %c0_i32 = arith.constant 0 : i32
    %c0_i32_0 = arith.constant 0 : i32
    return %c0_i32 : i32
  }
  func.func @transform_1(%arg0: i32) -> (i32, i32) {
    %c0_i32 = arith.constant 0 : i32
    %c0_i32_0 = arith.constant 0 : i32
    return %arg0, %c0_i32 : i32, i32
  }
  func.func @transform_2(%arg0: i32) -> (i32, i32) {
    %c0_i32 = arith.constant 0 : i32
    %c0_i32_0 = arith.constant 0 : i32
    return %arg0, %c0_i32 : i32, i32
  }
}

</mosaic_0001>

<bundles_post_ra>
// kernel: tpu_custom_call.1
= control target key start
LH: loop header
LB: loop body
LE: loop exit
PB: predicated region body
PF: predicated region fallthrough
CT: control target
= control target key end

     0   :  { %8 = vsyncpa [#allocation4], 0  ;;  %s224_s0 = inlined_call_operand.<no memory space> [shape: f32[1], index: 0, kind: input, shape index: {}]   ;;  %s225_s1 = inlined_call_operand.hbm [shape: f32[4,128], index: 1, kind: input, shape index: {}]   ;;  %s226_s2 = inlined_call_operand.hbm [shape: f32[4,128], index: 2, kind: output, shape index: {}]  }
   0x1   :  { %9 = vsyncpa [#allocation5], 0  ;;  %s166_s9 = smov [#allocation3]   ;;  %s118_s13 = scalar_lea.hbm %s225_s1, 64 }
   0x2   :  { %s18_s10 = sshll.u32 %s166_s9, 4  ;;  %p119_p0 = scmp.ne.s32.totalorder %s225_s1, %s118_s13  ;;  %s19_s10 = int_to_ptr.vmem [resolvable:$true] %s18_s10 }
   0x3   :  { %p122_p1 = scmp.lt.u32.totalorder %s118_s13, %s225_s1 }
   0x5   :  { %p124_p2 = pnand %p122_p1, %p119_p0 }
   0x7   :  { %127 = shalt.err (!%p124_p2)
}
   0x8   :  { %s128_s18 = scalar_lea.vmem %s19_s10, 64  ;;  %p133_p4 = scmp.lt.s32.totalorder %s19_s10, %s19_s10 }
   0x9   :  { %p129_p3 = scmp.ne.s32.totalorder %s19_s10, %s128_s18  ;;  %p134_p5 = scmp.lt.s32.totalorder %s128_s18, %s128_s18 }
   0xb   :  { %p135_p6 = por %p134_p5, %p133_p4 }
   0xd   :  { %p136_p7 = pnand %p135_p6, %p129_p3 }
   0xf   :  { %139 = shalt.err (!%p136_p7)
}
  0x10   :  { %21 = dma.hbm_to_vmem [thread:$0]  %s225_s1, 64, %s19_s10, [#allocation4]  }
  0x11   :  { %162 = dma.done.wait [#allocation4], 64  }
  0x12   :  { %163 = vsyncadd [#allocation4], 4294967232  ;;  %vm27_vm0 = vcmask 257024   ;;  %vm35_vm1 = vcmask 781824   ;;  %v26_v0 = vld [vmem:[#allocation3] sm:$0xf]  ;;  %v50_v13 = vstv %s224_s0 }
  0x13   :  { %vm31_vm2 = vcmask 519424   ;;  %vm39_vm3 = vcmask 1044224   ;;  %v28_v1 = vsel %vm27_vm0, %v26_v0, -inf  ;;  %v36_v2 = vsel %vm35_vm1, %v26_v0, -inf  ;;  %s167_s22 = smov 64   ;;  %s168_s23 = smov 96  }
  0x14   :  { %29 = vmax.xlane.f32.xlu0 %v28_v1  ;;  %37 = vmax.xlane.f32.xlu1 %v36_v2  ;;  %v32_v3 = vsel %vm31_vm2, %v26_v0, -inf  ;;  %v40_v4 = vsel %vm39_vm3, %v26_v0, -inf  ;;  %vm43_vm4 = vcmask 261120   ;;  %vm45_vm5 = vcmask 523264   ;;  %s169_s24 = smov 32   ;;  %s170_s0 = smov [#allocation6]  }
  0x15   :  { %vm47_vm6 = vcmask 785408   ;;  %s94_s25 = sshll.u32 %s170_s0, 4  ;;  %s95_s25 = int_to_ptr.vmem [resolvable:$true] %s94_s25 }
  0x16   :  { %s140_s26 = scalar_lea.vmem %s95_s25, 64  ;;  %p145_p9 = scmp.lt.s32.totalorder %s95_s25, %s95_s25 }
  0x17   :  { %p141_p8 = scmp.ne.s32.totalorder %s95_s25, %s140_s26  ;;  %p146_p10 = scmp.lt.s32.totalorder %s140_s26, %s140_s26 }
  0x18   :  { %33 = vmax.xlane.f32.xlu0 %v32_v3  ;;  %41 = vmax.xlane.f32.xlu1 %v40_v4 }
  0x19   :  { %p147_p11 = por %p146_p10, %p145_p9 }
  0x1b   :  { %p148_p12 = pnand %p147_p11, %p141_p8 }
  0xa1   :  { %v30_v5 = vpop.xlane.xlu0 %29  ;;  %v38_v6 = vpop.xlane.xlu1 %37 }
  0xa5   :  { %v34_v7 = vpop.xlane.xlu0 %33  ;;  %v42_v8 = vpop.xlane.xlu1 %41 }
  0xa6   :  { %v44_v9 = vsel %vm43_vm4, %v30_v5, %v34_v7 }
  0xa7   :  { %v46_v10 = vsel %vm45_vm5, %v44_v9, %v38_v6 }
  0xa8   :  { %v48_v11 = vsel %vm47_vm6, %v46_v10, %v42_v8 }
  0xa9   :  { %v49_v12 = vsub.f32 %v26_v0, %v48_v11 }
  0xab   :  { %v54_v14 = vmul.f32 1.442695, %v49_v12  ;;  %v51_v15 = vadd.f32 %v50_v13, %v49_v12 }
  0xad   :  { %108 = vpow2.f32 %v54_v14  ;;  %v52_v16 = vmax.f32 %v51_v15, 0.0 }
  0xaf   :  { %v53_v17 = vadd.f32 1e-08, %v52_v16 }
  0xb7   :  { %v109_v18 = vpop.eup %108 }
  0xb8   :  { %v56_v19 = vmul.f32 %v109_v18, %v53_v17 }
  0xba   :  { %67 = vrot.lane.b32.xlu1 %v56_v19, %s167_s22  ;;  %61 = vrot.lane.b32.xlu0 %v56_v19, %s168_s23  ;;  %v57_v20 = vsel %vm27_vm0, %v56_v19, 0.0 }
  0xbe   :  { %73 = vrot.lane.b32.xlu1 %v56_v19, %s169_s24 }
  0xe2   :  { %58 = vadd.xlane.f32.xlu1 %v57_v20 }
 0x12c   :  { %v68_v21 = vpop.permute.xlu1 %67  ;;  %v62_v22 = vpop.permute.xlu0 %61 }
 0x12d   :  { %v64_v23 = vsel %vm27_vm0, %v62_v22, 0.0  ;;  %v70_v24 = vsel %vm27_vm0, %v68_v21, 0.0 }
 0x12e   :  { %65 = vadd.xlane.f32.xlu0 %v64_v23 }
 0x130   :  { %v74_v25 = vpop.permute.xlu1 %73 }
 0x131   :  { %v76_v26 = vsel %vm27_vm0, %v74_v25, 0.0 }
 0x132   :  { %71 = vadd.xlane.f32.xlu0 %v70_v24 }
 0x136   :  { %77 = vadd.xlane.f32.xlu0 %v76_v26 }
 0x16f   :  { %v59_v28 = vpop.xlane.xlu1 %58 }
 0x1bb   :  { %v66_v27 = vpop.xlane.xlu0 %65 }
 0x1bc   :  { %110 = vrcp.f32 %v66_v27 }
 0x1bf   :  { %v72_v29 = vpop.xlane.xlu0 %71 }
 0x1c0   :  { %112 = vrcp.f32 %v72_v29 }
 0x1c1   :  { %114 = vrcp.f32 %v59_v28 }
 0x1c3   :  { %v78_v30 = vpop.xlane.xlu0 %77 }
 0x1c4   :  { %116 = vrcp.f32 %v78_v30 }
 0x1c6   :  { %v111_v31 = vpop.eup %110 }
 0x1ca   :  { %v113_v32 = vpop.eup %112 }
 0x1cb   :  { %v115_v33 = vpop.eup %114 }
 0x1cc   :  { %v83_v34 = vsel %vm43_vm4, %v115_v33, %v111_v31 }
 0x1cd   :  { %v84_v36 = vsel %vm45_vm5, %v83_v34, %v113_v32 }
 0x1ce   :  { %v117_v35 = vpop.eup %116 }
 0x1cf   :  { %v85_v37 = vsel %vm47_vm6, %v84_v36, %v117_v35 }
 0x1d0   :  { %v86_v38 = vmul.f32 %v85_v37, %v56_v19 }
 0x1d2   :  { %87 = vst [vmem:[#allocation6] sm:$0xf] %v86_v38 }
 0x1d3   :  { %151 = shalt.err (!%p148_p12)
}
 0x1d4   :  { %s152_s29 = scalar_lea.hbm %s226_s2, 64 }
 0x1d5   :  { %p153_p13 = scmp.ne.s32.totalorder %s226_s2, %s152_s29  ;;  %p156_p0 = scmp.lt.u32.totalorder %s152_s29, %s226_s2 }
 0x1d7   :  { %p158_p1 = pnand %p156_p0, %p153_p13 }
 0x1d9   :  { %161 = shalt.err (!%p158_p1)
}
 0x1da   :  { %97 = dma.vmem_to_hbm [thread:$0]  %s95_s25, 64, %s226_s2, [#allocation5]  }
 0x1db   :  { %164 = dma.done.wait [#allocation5], 64  }
 0x1dc   :  { %165 = vsyncadd [#allocation5], 4294967232 }
 0x1dd   :  { %101 = vsyncpa [#allocation4], 1 }
 0x1de   :  { %102 = vsyncpa [#allocation5], 1 }

</bundles_post_ra>
